<compile_context>
chip_gen: v6e
topology: v6e:2x2x1
jax: 0.10.0
libtpu: 0.0.40
codegen_flags: <defaults>
</compile_context>

<pallas_src>
import math
import numpy as np
import jax
import jax.numpy as jnp
from jax import lax
from jax.experimental import pallas as pl
from jax.experimental.pallas import tpu as pltpu  # noqa: F401  (TPU backend)

# ---- config (small, consistent with the module) ----
BATCH = 2
SEQ = 8
HIDDEN = 32
N_HEADS = 4
N_KV_HEADS = 2
HEAD_DIM = HIDDEN // N_HEADS          # 8
HALF = HEAD_DIM // 2                  # 4
N_GROUP = N_HEADS // N_KV_HEADS       # 2
INTER = 64
EPS = 1e-6

BS = BATCH * SEQ                      # 16 folded rows
QK_W = 2 * N_HEADS * HEAD_DIM         # 64  (q|k lanes)
QKV_W = 3 * N_HEADS * HEAD_DIM        # 96  (q|k|v lanes)
BIG_W = QKV_W + QK_W                  # 160 (q|k|v|rot_q|rot_k lanes)
SCALE = 1.0 / math.sqrt(HEAD_DIM)


# --------------------------- the fused kernel ---------------------------
def decoder_layer_kernel(x_ref, wbig_ref, cos_ref, sin_ref, mask_ref,
                         blocksel_ref, segsum_ref, segbcast_ref,
                         wo_ref, wgu_ref, wd_ref, out_ref):
    x = x_ref[...]                                              # (BS, H)

    # ---- input RMSNorm (gamma folded into wbig rows host-side) ----
    var = jnp.mean(x * x, axis=-1, keepdims=True)
    xn = x * lax.rsqrt(var + EPS)

    # ---- one fused projection: [q | k | v | rot_half(q) | rot_half(k)] ----
    big = jnp.dot(xn, wbig_ref[...], preferred_element_type=jnp.float32)   # (BS,160)

    # ---- RoPE on q|k lanes only (SCALE already folded into q columns) ----
    qk = big[:, :QK_W] * cos_ref[...] + big[:, QKV_W:] * sin_ref[...]      # (BS,64)
    v = big[:, QK_W:QKV_W]                                                  # (BS,32)
    q = qk[:, :HIDDEN]                                                      # (BS,32)
    k = qk[:, HIDDEN:]                                                      # (BS,32)

    # ---- block-diagonal [K | V]: head h occupies sublane rows [16h,16h+16),
    #      lanes (c % 32) in [8h, 8h+8); built with a precomputed 0/1 selector ----
    kv = jnp.concatenate([k, v], axis=1)                                    # (BS,64)
    kv_rep = jnp.concatenate([kv, kv, kv, kv], axis=0)                      # (4*BS,64)
    kvb = kv_rep * blocksel_ref[...]
    kb = kvb[:, :HIDDEN]                                                    # (64,32)
    vb = kvb[:, HIDDEN:]                                                    # (64,32)

    # ---- all-head scores in ONE NT matmul -> lane-dense (BS, 4*BS) slab ----
    s = lax.dot_general(q, kb, (((1,), (1,)), ((), ())),
                        preferred_element_type=jnp.float32) + mask_ref[...]
    # global row-max is a valid (shift-invariant) stabilizer for every head block
    m = jnp.max(s, axis=-1, keepdims=True)
    e = jnp.exp(s - m)                                                      # (BS,64)
    d = jnp.dot(e, segsum_ref[...], preferred_element_type=jnp.float32)     # (BS,4)
    r = pl.reciprocal(d, approx=True)
    r = r * (2.0 - d * r)                       # one Newton step -> ~f32 exact
    pv = jnp.dot(e, vb, preferred_element_type=jnp.float32)                 # (BS,32)
    attn = pv * jnp.dot(r, segbcast_ref[...], preferred_element_type=jnp.float32)

    # ---- fused o_proj + residual ----
    rep1 = x + jnp.dot(attn, wo_ref[...], preferred_element_type=jnp.float32)

    # ---- post-attention RMSNorm (gamma folded into wgu) + fused SwiGLU MLP ----
    var2 = jnp.mean(rep1 * rep1, axis=-1, keepdims=True)
    xn2 = rep1 * lax.rsqrt(var2 + EPS)
    gu = jnp.dot(xn2, wgu_ref[...], preferred_element_type=jnp.float32)     # (BS,128)
    g = gu[:, :INTER]
    u = gu[:, INTER:]
    hact = g * jax.nn.sigmoid(g) * u
    down = jnp.dot(hact, wd_ref[...], preferred_element_type=jnp.float32)

    out_ref[...] = rep1 + down


# ----------------- host-side one-time parameter packing -----------------
def pack_decoder_params(ln1, ln2, wq, wk, wv, wo, wg, wu, wd, cos, sin, batch, seq):
    H = wq.shape[0]
    bs = batch * seq

    # GQA repeat folded into K/V weights, SCALE into Q columns, ln1 gamma into rows
    wk_rep = jnp.repeat(wk.reshape(H, N_KV_HEADS, HEAD_DIM), N_GROUP, axis=1)
    wk_rep = wk_rep.reshape(H, N_HEADS * HEAD_DIM)
    wv_rep = jnp.repeat(wv.reshape(H, N_KV_HEADS, HEAD_DIM), N_GROUP, axis=1)
    wv_rep = wv_rep.reshape(H, N_HEADS * HEAD_DIM)
    wqkv = jnp.concatenate([wq * SCALE, wk_rep, wv_rep], axis=1)            # (H,96)
    wqkv = ln1.reshape(-1)[:, None] * wqkv

    # rotate_half folded into the projection: signed permutation per q/k head block
    rot = np.zeros((QK_W, QK_W), np.float32)
    for blk in range(2 * N_HEADS):
        b0 = blk * HEAD_DIM
        for j in range(HALF):
            rot[b0 + j + HALF, b0 + j] = -1.0      # out[j]      = -in[j+half]
            rot[b0 + j, b0 + j + HALF] = 1.0       # out[j+half] = +in[j]
    w_rot = wqkv[:, :QK_W] @ jnp.asarray(rot)                               # (H,64)
    wbig = jnp.concatenate([wqkv, w_rot], axis=1)                           # (H,160)

    # lane-tiled RoPE tables over the q|k lanes only
    cos_bs = jnp.tile(cos, (batch, 1))                                      # (bs, hd)
    sin_bs = jnp.tile(sin, (batch, 1))
    cos64 = jnp.tile(cos_bs, (1, 2 * N_HEADS))                              # (bs, 64)
    sin64 = jnp.tile(sin_bs, (1, 2 * N_HEADS))

    # causal + batch-block additive mask, replicated per head block -> (bs, 4*bs)
    idx = np.arange(bs)
    same_batch = (idx[:, None] // seq) == (idx[None, :] // seq)
    causal = (idx[None, :] % seq) <= (idx[:, None] % seq)
    m = np.where(same_batch & causal, 0.0, -np.inf).astype(np.float32)
    mask = jnp.asarray(np.tile(m, (1, N_HEADS)))                            # (bs, 64)

    # block-diag selector for [K | V]: row h*bs+i keeps lanes (c % 32) in [8h,8h+8)
    blocksel = np.zeros((N_HEADS * bs, 2 * H), np.float32)
    segsum = np.zeros((N_HEADS * bs, N_HEADS), np.float32)
    segbcast = np.zeros((N_HEADS, H), np.float32)
    for h in range(N_HEADS):
        blocksel[h * bs:(h + 1) * bs, h * HEAD_DIM:(h + 1) * HEAD_DIM] = 1.0
        blocksel[h * bs:(h + 1) * bs, H + h * HEAD_DIM:H + (h + 1) * HEAD_DIM] = 1.0
        segsum[h * bs:(h + 1) * bs, h] = 1.0
        segbcast[h, h * HEAD_DIM:(h + 1) * HEAD_DIM] = 1.0

    # ln2 gamma folded into fused gate/up rows
    wgu = ln2.reshape(-1)[:, None] * jnp.concatenate([wg, wu], axis=1)      # (H,128)

    return (wbig, cos64, sin64, mask, jnp.asarray(blocksel),
            jnp.asarray(segsum), jnp.asarray(segbcast), wo, wgu, wd)


# ------------------------------ wrapper ------------------------------
def decoder_layer_fused(rep, packed):
    B, S, H = rep.shape
    (wbig, cos64, sin64, mask, blocksel, segsum, segbcast, wo, wgu, wd) = packed
    x = rep.reshape(B * S, H)
    cost = pl.CostEstimate(flops=540_000, transcendentals=2_100, bytes_accessed=84_000)
    out = pl.pallas_call(
        decoder_layer_kernel,
        out_shape=jax.ShapeDtypeStruct((B * S, H), jnp.float32),
        cost_estimate=cost,
    )(x, wbig, cos64, sin64, mask, blocksel, segsum, segbcast, wo, wgu, wd)
    return out.reshape(B, S, H)


# ---------------- pure-JAX reference (mirrors the PyTorch forward) ----------------
def reference(rep, ln1, cos, sin, wq, wk, wv, wo, ln2, wg, wu, wd):
    B, S, H = rep.shape

    def rms(x, w):
        var = jnp.mean(x * x, axis=-1, keepdims=True)
        return x * lax.rsqrt(var + EPS) * w[0]

    residual = rep
    x = rms(rep, ln1)
    q = (x @ wq).reshape(B, S, N_HEADS, HEAD_DIM)
    k = (x @ wk).reshape(B, S, N_KV_HEADS, HEAD_DIM)
    v = (x @ wv).reshape(B, S, N_KV_HEADS, HEAD_DIM)

    c = cos[None, :, None, :]
    s = sin[None, :, None, :]

    def rot_half(t):
        t1, t2 = jnp.split(t, 2, axis=-1)
        return jnp.concatenate([-t2, t1], axis=-1)

    q = q * c + rot_half(q) * s
    k = k * c + rot_half(k) * s
    k = jnp.repeat(k, N_GROUP, axis=2)
    v = jnp.repeat(v, N_GROUP, axis=2)

    q = q.transpose(0, 2, 1, 3)
    k = k.transpose(0, 2, 1, 3)
    v = v.transpose(0, 2, 1, 3)
    scores = q @ k.transpose(0, 1, 3, 2) / math.sqrt(HEAD_DIM)
    mask = jnp.triu(jnp.full((S, S), -jnp.inf), k=1)
    scores = scores + mask[None, None]
    p = jax.nn.softmax(scores, axis=-1)
    out = (p @ v).transpose(0, 2, 1, 3).reshape(B, S, N_HEADS * HEAD_DIM)
    out = out @ wo
    rep1 = residual + out

    x2 = rms(rep1, ln2)
    down = (jax.nn.silu(x2 @ wg) * (x2 @ wu)) @ wd
    return rep1 + down


if __name__ == "__main__":
    key = jax.random.PRNGKey(0)
    ks = jax.random.split(key, 8)

    rep = jax.random.normal(ks[0], (BATCH, SEQ, HIDDEN), dtype=jnp.float32)

    def w(k, shape):
        return 0.02 * jax.random.normal(k, shape, dtype=jnp.float32)

    # Linear weights stored as (in_features, out_features); attention_bias / mlp_bias = False
    wq = w(ks[1], (HIDDEN, N_HEADS * HEAD_DIM))
    wk = w(ks[2], (HIDDEN, N_KV_HEADS * HEAD_DIM))
    wv = w(ks[3], (HIDDEN, N_KV_HEADS * HEAD_DIM))
    wo = w(ks[4], (N_HEADS * HEAD_DIM, HIDDEN))
    wg = w(ks[5], (HIDDEN, INTER))
    wu = w(ks[6], (HIDDEN, INTER))
    wd = w(ks[7], (INTER, HIDDEN))
    ln1 = jnp.ones((1, HIDDEN), dtype=jnp.float32)
    ln2 = jnp.ones((1, HIDDEN), dtype=jnp.float32)

    # RoPE tables (matches RotaryEmbedding buffers, sliced to seq_len)
    inv_freq = 1.0 / (10000.0 ** (jnp.arange(0, HEAD_DIM, 2, dtype=jnp.float32) / HEAD_DIM))
    t = jnp.arange(SEQ, dtype=jnp.float32)[:, None]
    freqs = t * inv_freq[None, :]
    freqs = jnp.concatenate([freqs, freqs], axis=-1)
    cos = jnp.cos(freqs)
    sin = jnp.sin(freqs)

    # one-time host-side packing (fused + rotate-folded weights, RoPE tables,
    # mask slab, block-diag selectors)
    packed = pack_decoder_params(ln1, ln2, wq, wk, wv, wo, wg, wu, wd, cos, sin, BATCH, SEQ)
    packed = jax.tree_util.tree_map(jax.block_until_ready, packed)

    run = jax.jit(decoder_layer_fused)
    out = jax.block_until_ready(run(rep, packed))

    ref = reference(rep, ln1, cos, sin, wq, wk, wv, wo, ln2, wg, wu, wd)
    np.testing.assert_allclose(np.asarray(out), np.asarray(ref), rtol=1e-4, atol=1e-4)

    print("KERNEL_OK")
</pallas_src>

<mosaic_0001>
module attributes {stable_mosaic.version = 11 : i64} {
  func.func @decoder_layer_kernel(%arg0: memref<16x32xf32, #tpu.memory_space<vmem>>, %arg1: memref<32x160xf32, #tpu.memory_space<vmem>>, %arg2: memref<16x64xf32, #tpu.memory_space<vmem>>, %arg3: memref<16x64xf32, #tpu.memory_space<vmem>>, %arg4: memref<16x64xf32, #tpu.memory_space<vmem>>, %arg5: memref<64x64xf32, #tpu.memory_space<vmem>>, %arg6: memref<64x4xf32, #tpu.memory_space<vmem>>, %arg7: memref<4x32xf32, #tpu.memory_space<vmem>>, %arg8: memref<32x32xf32, #tpu.memory_space<vmem>>, %arg9: memref<32x128xf32, #tpu.memory_space<vmem>>, %arg10: memref<64x32xf32, #tpu.memory_space<vmem>>, %arg11: memref<16x32xf32, #tpu.memory_space<vmem>>) attributes {dimension_semantics = [], scalar_prefetch = 0 : i64, scratch_operands = 0 : i64, tpu.core_type = #tpu.core_type<tc>} {
    %c0 = arith.constant 0 : index
    %c0_0 = arith.constant 0 : index
    %0 = vector.load %arg0[%c0, %c0_0] : memref<16x32xf32, #tpu.memory_space<vmem>>, vector<16x32xf32>
    %1 = arith.mulf %0, %0 : vector<16x32xf32>
    %cst = arith.constant dense<0.000000e+00> : vector<16xf32>
    %2 = vector.multi_reduction <add>, %1, %cst [1] : vector<16x32xf32> to vector<16xf32>
    %3 = vector.shape_cast %2 : vector<16xf32> to vector<16x1xf32>
    %cst_1 = arith.constant 3.200000e+01 : f32
    %4 = vector.broadcast %cst_1 : f32 to vector<16x1xf32>
    %5 = arith.divf %3, %4 : vector<16x1xf32>
    %cst_2 = arith.constant 9.99999997E-7 : f32
    %6 = vector.broadcast %cst_2 : f32 to vector<16x1xf32>
    %7 = arith.addf %5, %6 : vector<16x1xf32>
    %8 = math.rsqrt %7 : vector<16x1xf32>
    %9 = vector.broadcast %8 : vector<16x1xf32> to vector<16x32xf32>
    %10 = arith.mulf %0, %9 : vector<16x32xf32>
    %c0_3 = arith.constant 0 : index
    %c0_4 = arith.constant 0 : index
    %11 = vector.load %arg1[%c0_3, %c0_4] : memref<32x160xf32, #tpu.memory_space<vmem>>, vector<32x160xf32>
    %cst_5 = arith.constant dense<0.000000e+00> : vector<16x160xf32>
    %12 = tpu.matmul %10, %11, %cst_5 {dimension_numbers = #tpu.dot_dimension_numbers<[1], [0], [0], [1], [0, 0, 1, 1], [], []>} : vector<16x32xf32>, vector<32x160xf32>, vector<16x160xf32> -> vector<16x160xf32>
    %13 = vector.extract_strided_slice %12 {offsets = [0, 0], sizes = [16, 64], strides = [1, 1]} : vector<16x160xf32> to vector<16x64xf32>
    %c0_6 = arith.constant 0 : index
    %c0_7 = arith.constant 0 : index
    %14 = vector.load %arg2[%c0_6, %c0_7] : memref<16x64xf32, #tpu.memory_space<vmem>>, vector<16x64xf32>
    %15 = arith.mulf %13, %14 : vector<16x64xf32>
    %16 = vector.extract_strided_slice %12 {offsets = [0, 96], sizes = [16, 64], strides = [1, 1]} : vector<16x160xf32> to vector<16x64xf32>
    %c0_8 = arith.constant 0 : index
    %c0_9 = arith.constant 0 : index
    %17 = vector.load %arg3[%c0_8, %c0_9] : memref<16x64xf32, #tpu.memory_space<vmem>>, vector<16x64xf32>
    %18 = arith.mulf %16, %17 : vector<16x64xf32>
    %19 = arith.addf %15, %18 : vector<16x64xf32>
    %20 = vector.extract_strided_slice %12 {offsets = [0, 64], sizes = [16, 32], strides = [1, 1]} : vector<16x160xf32> to vector<16x32xf32>
    %21 = vector.extract_strided_slice %19 {offsets = [0, 0], sizes = [16, 32], strides = [1, 1]} : vector<16x64xf32> to vector<16x32xf32>
    %22 = vector.extract_strided_slice %19 {offsets = [0, 32], sizes = [16, 32], strides = [1, 1]} : vector<16x64xf32> to vector<16x32xf32>
    %23 = tpu.concatenate %22, %20 in 1 : vector<16x32xf32>, vector<16x32xf32> -> vector<16x64xf32>
    %24 = tpu.concatenate %23, %23, %23, %23 in 0 : vector<16x64xf32>, vector<16x64xf32>, vector<16x64xf32>, vector<16x64xf32> -> vector<64x64xf32>
    %c0_10 = arith.constant 0 : index
    %c0_11 = arith.constant 0 : index
    %25 = vector.load %arg5[%c0_10, %c0_11] : memref<64x64xf32, #tpu.memory_space<vmem>>, vector<64x64xf32>
    %26 = arith.mulf %24, %25 : vector<64x64xf32>
    %27 = vector.extract_strided_slice %26 {offsets = [0, 0], sizes = [64, 32], strides = [1, 1]} : vector<64x64xf32> to vector<64x32xf32>
    %28 = vector.extract_strided_slice %26 {offsets = [0, 32], sizes = [64, 32], strides = [1, 1]} : vector<64x64xf32> to vector<64x32xf32>
    %cst_12 = arith.constant dense<0.000000e+00> : vector<16x64xf32>
    %29 = tpu.matmul %21, %27, %cst_12 {dimension_numbers = #tpu.dot_dimension_numbers<[1], [1], [0], [0], [0, 0, 1, 0], [], []>} : vector<16x32xf32>, vector<64x32xf32>, vector<16x64xf32> -> vector<16x64xf32>
    %c0_13 = arith.constant 0 : index
    %c0_14 = arith.constant 0 : index
    %30 = vector.load %arg4[%c0_13, %c0_14] : memref<16x64xf32, #tpu.memory_space<vmem>>, vector<16x64xf32>
    %31 = arith.addf %29, %30 : vector<16x64xf32>
    %cst_15 = arith.constant dense<0xFF800000> : vector<16xf32>
    %32 = vector.multi_reduction <maximumf>, %31, %cst_15 [1] : vector<16x64xf32> to vector<16xf32>
    %33 = vector.shape_cast %32 : vector<16xf32> to vector<16x1xf32>
    %34 = vector.broadcast %33 : vector<16x1xf32> to vector<16x64xf32>
    %35 = arith.subf %31, %34 : vector<16x64xf32>
    %36 = math.exp %35 : vector<16x64xf32>
    %c0_16 = arith.constant 0 : index
    %c0_17 = arith.constant 0 : index
    %37 = vector.load %arg6[%c0_16, %c0_17] : memref<64x4xf32, #tpu.memory_space<vmem>>, vector<64x4xf32>
    %cst_18 = arith.constant dense<0.000000e+00> : vector<16x4xf32>
    %38 = tpu.matmul %36, %37, %cst_18 {dimension_numbers = #tpu.dot_dimension_numbers<[1], [0], [0], [1], [0, 0, 1, 1], [], []>} : vector<16x64xf32>, vector<64x4xf32>, vector<16x4xf32> -> vector<16x4xf32>
    %39 = tpu.reciprocal %38 {approx = true} : vector<16x4xf32> -> vector<16x4xf32>
    %40 = arith.mulf %38, %39 : vector<16x4xf32>
    %cst_19 = arith.constant 2.000000e+00 : f32
    %41 = vector.broadcast %cst_19 : f32 to vector<16x4xf32>
    %42 = arith.subf %41, %40 : vector<16x4xf32>
    %43 = arith.mulf %39, %42 : vector<16x4xf32>
    %cst_20 = arith.constant dense<0.000000e+00> : vector<16x32xf32>
    %44 = tpu.matmul %36, %28, %cst_20 {dimension_numbers = #tpu.dot_dimension_numbers<[1], [0], [0], [1], [0, 0, 1, 1], [], []>} : vector<16x64xf32>, vector<64x32xf32>, vector<16x32xf32> -> vector<16x32xf32>
    %c0_21 = arith.constant 0 : index
    %c0_22 = arith.constant 0 : index
    %45 = vector.load %arg7[%c0_21, %c0_22] : memref<4x32xf32, #tpu.memory_space<vmem>>, vector<4x32xf32>
    %cst_23 = arith.constant dense<0.000000e+00> : vector<16x32xf32>
    %46 = tpu.matmul %43, %45, %cst_23 {dimension_numbers = #tpu.dot_dimension_numbers<[1], [0], [0], [1], [0, 0, 1, 1], [], []>} : vector<16x4xf32>, vector<4x32xf32>, vector<16x32xf32> -> vector<16x32xf32>
    %47 = arith.mulf %44, %46 : vector<16x32xf32>
    %c0_24 = arith.constant 0 : index
    %c0_25 = arith.constant 0 : index
    %48 = vector.load %arg8[%c0_24, %c0_25] : memref<32x32xf32, #tpu.memory_space<vmem>>, vector<32x32xf32>
    %cst_26 = arith.constant dense<0.000000e+00> : vector<16x32xf32>
    %49 = tpu.matmul %47, %48, %cst_26 {dimension_numbers = #tpu.dot_dimension_numbers<[1], [0], [0], [1], [0, 0, 1, 1], [], []>} : vector<16x32xf32>, vector<32x32xf32>, vector<16x32xf32> -> vector<16x32xf32>
    %50 = arith.addf %0, %49 : vector<16x32xf32>
    %51 = arith.mulf %50, %50 : vector<16x32xf32>
    %cst_27 = arith.constant dense<0.000000e+00> : vector<16xf32>
    %52 = vector.multi_reduction <add>, %51, %cst_27 [1] : vector<16x32xf32> to vector<16xf32>
    %53 = vector.shape_cast %52 : vector<16xf32> to vector<16x1xf32>
    %cst_28 = arith.constant 3.200000e+01 : f32
    %54 = vector.broadcast %cst_28 : f32 to vector<16x1xf32>
    %55 = arith.divf %53, %54 : vector<16x1xf32>
    %cst_29 = arith.constant 9.99999997E-7 : f32
    %56 = vector.broadcast %cst_29 : f32 to vector<16x1xf32>
    %57 = arith.addf %55, %56 : vector<16x1xf32>
    %58 = math.rsqrt %57 : vector<16x1xf32>
    %59 = vector.broadcast %58 : vector<16x1xf32> to vector<16x32xf32>
    %60 = arith.mulf %50, %59 : vector<16x32xf32>
    %c0_30 = arith.constant 0 : index
    %c0_31 = arith.constant 0 : index
    %61 = vector.load %arg9[%c0_30, %c0_31] : memref<32x128xf32, #tpu.memory_space<vmem>>, vector<32x128xf32>
    %cst_32 = arith.constant dense<0.000000e+00> : vector<16x128xf32>
    %62 = tpu.matmul %60, %61, %cst_32 {dimension_numbers = #tpu.dot_dimension_numbers<[1], [0], [0], [1], [0, 0, 1, 1], [], []>} : vector<16x32xf32>, vector<32x128xf32>, vector<16x128xf32> -> vector<16x128xf32>
    %63 = vector.extract_strided_slice %62 {offsets = [0, 0], sizes = [16, 64], strides = [1, 1]} : vector<16x128xf32> to vector<16x64xf32>
    %64 = vector.extract_strided_slice %62 {offsets = [0, 64], sizes = [16, 64], strides = [1, 1]} : vector<16x128xf32> to vector<16x64xf32>
    %65 = arith.negf %63 : vector<16x64xf32>
    %66 = math.exp %65 : vector<16x64xf32>
    %cst_33 = arith.constant 1.000000e+00 : f32
    %67 = vector.broadcast %cst_33 : f32 to vector<16x64xf32>
    %68 = arith.addf %67, %66 : vector<16x64xf32>
    %69 = arith.divf %67, %68 : vector<16x64xf32>
    %70 = arith.mulf %63, %69 : vector<16x64xf32>
    %71 = arith.mulf %70, %64 : vector<16x64xf32>
    %c0_34 = arith.constant 0 : index
    %c0_35 = arith.constant 0 : index
    %72 = vector.load %arg10[%c0_34, %c0_35] : memref<64x32xf32, #tpu.memory_space<vmem>>, vector<64x32xf32>
    %cst_36 = arith.constant dense<0.000000e+00> : vector<16x32xf32>
    %73 = tpu.matmul %71, %72, %cst_36 {dimension_numbers = #tpu.dot_dimension_numbers<[1], [0], [0], [1], [0, 0, 1, 1], [], []>} : vector<16x64xf32>, vector<64x32xf32>, vector<16x32xf32> -> vector<16x32xf32>
    %74 = arith.addf %50, %73 : vector<16x32xf32>
    %c0_37 = arith.constant 0 : index
    %c0_38 = arith.constant 0 : index
    %75 = vector.load %arg11[%c0_37, %c0_38] : memref<16x32xf32, #tpu.memory_space<vmem>>, vector<16x32xf32>
    tpu.vector_store %arg11[%c0_37, %c0_38], %74 {strides = array<i32>} : memref<16x32xf32, #tpu.memory_space<vmem>>, vector<16x32xf32>,
    return
  }
}

</mosaic_0001>

<bundles_post_ra>
// kernel: decoder_layer_fused.1
= control target key start
LH: loop header
LB: loop body
LE: loop exit
PB: predicated region body
PF: predicated region fallthrough
CT: control target
= control target key end

     0   :  { %16 = vsyncpa [#allocation3], 0  ;;  %s1701_s0 = inlined_call_operand.hbm [shape: f32[16,32], index: 0, kind: input, shape index: {}]   ;;  %s1702_s1 = inlined_call_operand.vmem [shape: f32[32,160], index: 1, kind: input, shape index: {}]   ;;  %s1703_s2 = inlined_call_operand.hbm [shape: f32[16,64], index: 2, kind: input, shape index: {}]   ;;  %s1704_s3 = inlined_call_operand.hbm [shape: f32[16,64], index: 3, kind: input, shape index: {}]   ;;  %s1705_s4 = inlined_call_operand.hbm [shape: f32[16,64], index: 4, kind: input, shape index: {}]   ;;  %s1706_s5 = inlined_call_operand.vmem [shape: f32[64,64], index: 5, kind: input, shape index: {}]   ;;  %s1707_s6 = inlined_call_operand.vmem [shape: f32[64,4], index: 6, kind: input, shape index: {}]   ;;  %s1708_s7 = inlined_call_operand.vmem [shape: f32[4,32], index: 7, kind: input, shape index: {}]   ;;  %s1709_s8 = inlined_call_operand.hbm [shape: f32[32,32], index: 8, kind: input, shape index: {}]   ;;  %s1710_s9 = inlined_call_operand.hbm [shape: f32[32,128], index: 9, kind: input, shape index: {}]   ;;  %s1711_s10 = inlined_call_operand.vmem [shape: f32[64,32], index: 10, kind: input, shape index: {}]   ;;  %s1712_s11 = inlined_call_operand.hbm [shape: f32[16,32], index: 11, kind: output, shape index: {}]  }
   0x1   :  { %17 = vsyncpa [#allocation6], 0 }
   0x2   :  { %18 = vsyncpa [#allocation9], 0 }
   0x3   :  { %19 = vsyncpa [#allocation12], 0 }
   0x4   :  { %20 = vsyncpa [#allocation4], 0  ;;  %s1402_s17 = smov [#allocation5]   ;;  %s1403_s19 = smov [#allocation8]  }
   0x5   :  { %s40_s18 = sshll.u32 %s1402_s17, 4  ;;  %s64_s20 = sshll.u32 %s1403_s19, 4  ;;  %s41_s18 = int_to_ptr.vmem [resolvable:$true] %s40_s18  ;;  %s65_s20 = int_to_ptr.vmem [resolvable:$true] %s64_s20 }
   0x6   :  { %s1260_s21 = scalar_lea.vmem %s41_s18, 256  ;;  %p1265_p1 = scmp.lt.s32.totalorder %s41_s18, %s41_s18 }
   0x7   :  { %p1261_p0 = scmp.ne.s32.totalorder %s41_s18, %s1260_s21  ;;  %p1266_p2 = scmp.lt.s32.totalorder %s1260_s21, %s1260_s21 }
   0x9   :  { %p1267_p3 = por %p1266_p2, %p1265_p1 }
   0xb   :  { %p1268_p4 = pnand %p1267_p3, %p1261_p0 }
   0xd   :  { %1271 = shalt.err (!%p1268_p4)
}
   0xe   :  { %s1404_s22 = smov 128   ;;  %s1405_s23 = smov 8  }
   0xf   :  { %46 = dma.hbm_to_vmem [thread:$0]  %s1703_s2, 256, %s41_s18, [#allocation6], %s1404_s22, %s1404_s22, %s1405_s23  }
  0x10   :  { %s1280_s26 = scalar_lea.vmem %s65_s20, 256  ;;  %p1285_p6 = scmp.lt.s32.totalorder %s65_s20, %s65_s20 }
  0x11   :  { %p1281_p5 = scmp.ne.s32.totalorder %s65_s20, %s1280_s26  ;;  %p1286_p7 = scmp.lt.s32.totalorder %s1280_s26, %s1280_s26 }
  0x13   :  { %p1287_p8 = por %p1286_p7, %p1285_p6 }
  0x15   :  { %p1288_p9 = pnand %p1287_p8, %p1281_p5 }
  0x17   :  { %1291 = shalt.err (!%p1288_p9)
}
  0x18   :  { %70 = dma.hbm_to_vmem [thread:$0]  %s1705_s4, 256, %s65_s20, [#allocation9], %s1404_s22, %s1404_s22, %s1405_s23  }
  0x19   :  { %s1406_s29 = smov [#allocation2]   ;;  %s1407_s12 = smov [#allocation7]  }
  0x1a   :  { %s26_s30 = sshll.u32 %s1406_s29, 4  ;;  %s52_s13 = sshll.u32 %s1407_s12, 4  ;;  %s27_s30 = int_to_ptr.vmem [resolvable:$true] %s26_s30  ;;  %s53_s13 = int_to_ptr.vmem [resolvable:$true] %s52_s13 }
  0x1b   :  { %s1300_s2 = scalar_lea.vmem %s27_s30, 256  ;;  %p1305_p11 = scmp.lt.s32.totalorder %s27_s30, %s27_s30 }
  0x1c   :  { %p1301_p10 = scmp.ne.s32.totalorder %s27_s30, %s1300_s2  ;;  %p1306_p12 = scmp.lt.s32.totalorder %s1300_s2, %s1300_s2 }
  0x1e   :  { %p1307_p13 = por %p1306_p12, %p1305_p11 }
  0x20   :  { %p1308_p0 = pnand %p1307_p13, %p1301_p10 }
  0x22   :  { %1311 = shalt.err (!%p1308_p0)
}
  0x23   :  { %32 = dma.hbm_to_vmem [thread:$0]  %s1701_s0, 256, %s27_s30, [#allocation3], %s1404_s22, %s1404_s22, %s1405_s23  }
  0x24   :  { %s1320_s4 = scalar_lea.vmem %s53_s13, 256  ;;  %p1325_p2 = scmp.lt.s32.totalorder %s53_s13, %s53_s13 }
  0x25   :  { %p1321_p1 = scmp.ne.s32.totalorder %s53_s13, %s1320_s4  ;;  %p1326_p3 = scmp.lt.s32.totalorder %s1320_s4, %s1320_s4 }
  0x27   :  { %p1327_p4 = por %p1326_p3, %p1325_p2 }
  0x29   :  { %p1328_p5 = pnand %p1327_p4, %p1321_p1 }
  0x2b   :  { %1331 = shalt.err (!%p1328_p5)
}
  0x2c   :  { %58 = dma.hbm_to_vmem [thread:$0]  %s1704_s3, 256, %s53_s13, [#allocation6], %s1404_s22, %s1404_s22, %s1405_s23  }
  0x2d   :  { %s1408_s18 = smov [#allocation10]   ;;  %s1409_s20 = smov [#allocation11]  }
  0x2e   :  { %s82_s19 = sshll.u32 %s1408_s18, 4  ;;  %s94_s21 = sshll.u32 %s1409_s20, 4  ;;  %s83_s19 = int_to_ptr.vmem [resolvable:$true] %s82_s19  ;;  %s95_s21 = int_to_ptr.vmem [resolvable:$true] %s94_s21 }
  0x2f   :  { %s1340_s0 = scalar_lea.vmem %s83_s19, 512  ;;  %p1345_p7 = scmp.lt.s32.totalorder %s83_s19, %s83_s19 }
  0x30   :  { %p1341_p6 = scmp.ne.s32.totalorder %s83_s19, %s1340_s0  ;;  %p1346_p8 = scmp.lt.s32.totalorder %s1340_s0, %s1340_s0 }
  0x32   :  { %p1347_p9 = por %p1346_p8, %p1345_p7 }
  0x34   :  { %p1348_p10 = pnand %p1347_p9, %p1341_p6 }
  0x36   :  { %1351 = shalt.err (!%p1348_p10)
}
  0x37   :  { %88 = dma.hbm_to_vmem [thread:$0]  %s1709_s8, 512, %s83_s19, [#allocation9], %s1404_s22, %s1404_s22, %s1405_s23  }
  0x38   :  { %s1360_s3 = scalar_lea.vmem %s95_s21, 512  ;;  %p1365_p12 = scmp.lt.s32.totalorder %s95_s21, %s95_s21 }
  0x39   :  { %p1361_p11 = scmp.ne.s32.totalorder %s95_s21, %s1360_s3  ;;  %p1366_p13 = scmp.lt.s32.totalorder %s1360_s3, %s1360_s3 }
  0x3b   :  { %p1367_p0 = por %p1366_p13, %p1365_p12 }
  0x3d   :  { %p1368_p1 = pnand %p1367_p0, %p1361_p11 }
  0x3f   :  { %1371 = shalt.err (!%p1368_p1)
}
  0x40   :  { %100 = dma.hbm_to_vmem [thread:$0]  %s1710_s9, 512, %s95_s21, [#allocation12], %s1404_s22, %s1404_s22, %s1405_s23  }
  0x41   :  { %1392 = dma.done.wait [#allocation3], 256  }
  0x42   :  { %1393 = vsyncadd [#allocation3], 4294967040 }
  0x43   :  { %1394 = dma.done.wait [#allocation6], 512  }
  0x44   :  { %1395 = vsyncadd [#allocation6], 4294966784 }
  0x45   :  { %1396 = dma.done.wait [#allocation9], 768  }
  0x46   :  { %1397 = vsyncadd [#allocation9], 4294966528 }
  0x47   :  { %1398 = dma.done.wait [#allocation12], 512  }
  0x48   :  { %1399 = vsyncadd [#allocation12], 4294966784  ;;  %v1511_v0 = vld [vmem:[#allocation2] sm:$0xff]  ;;  %vm125_vm0 = vcmask 261120   ;;  %v1513_v1 = vld [vmem:[#allocation2 + $0x8] sm:$0xff]  ;;  %v1410_v10 = vmov 0.0  }
  0x49   :  { %v123_v2 = vmul.f32 %v1511_v0, %v1511_v0  ;;  %v124_v3 = vmul.f32 %v1513_v1, %v1513_v1  ;;  %v148_v6 = vld [vmem:[%s1702_s1 + $0x38] sm:$0xff]  ;;  %v147_v7 = vld [vmem:[%s1702_s1 + $0x30] sm:$0xff]  ;;  %v146_v8 = vld [vmem:[%s1702_s1 + $0x28] sm:$0xff]  ;;  %219 = vmatprep.mubr.f32.mxu0 %v1410_v10  ;;  %s1411_s21 = smov 96   ;;  %vm407_vm1 = vcmask 523264   ;;  %vm624_vm2 = vcmask 1043456  }
  0x4a   :  { %179 = vmatprep.subr.mxu0 %v148_v6  ;;  %v145_v9 = vld [vmem:[%s1702_s1 + $0x20] sm:$0xff]  ;;  %v144_v11 = vld [vmem:[%s1702_s1 + $0x18] sm:$0xff]  ;;  %v143_v12 = vld [vmem:[%s1702_s1 + $0x10] sm:$0xff]  ;;  %vm617_vm3 = vcmask 31744  }
  0x4b   :  { %v126_v4 = vsel %vm125_vm0, %v123_v2, 0.0  ;;  %v129_v5 = vsel %vm125_vm0, %v124_v3, 0.0  ;;  %180 = vmatpush1.msra.mxu0 %v147_v7  ;;  %v142_v13 = vld [vmem:[%s1702_s1 + $0x8] sm:$0xff]  ;;  %v141_v14 = vld [vmem:[%s1702_s1] sm:$0xff]  ;;  %s1412_s1 = smov 32   ;;  %v233_v38 = vld [vmem:[#allocation5 + $0x8] sm:$0xff] }
  0x4c   :  { %127 = vadd.xlane.f32.xlu0 %v126_v4  ;;  %181 = vmatprep.subr.mxu0 %v146_v8  ;;  %v237_v15 = vld [vmem:[#allocation7 + $0x8] sm:$0xff]  ;;  %v236_v16 = vld [vmem:[#allocation7] sm:$0xff]  ;;  %v232_v42 = vld [vmem:[#allocation5] sm:$0xff] }
  0x4d   :  { %182 = vmatpush1.msra.mxu0 %v145_v9  ;;  %242 = vrot.lane.b32.xlu1 %v237_v15, %s1411_s21  ;;  %v293_v50 = vld [vmem:[%s1706_s5 + $0x38] sm:$0xff]  ;;  %v292_v54 = vld [vmem:[%s1706_s5 + $0x30] sm:$0xff]  ;;  %v291_v57 = vld [vmem:[%s1706_s5 + $0x28] sm:$0xff] }
  0x4e   :  { %183 = vmatprep.subr.mxu0 %v144_v11  ;;  %v290_v61 = vld [vmem:[%s1706_s5 + $0x20] sm:$0xff]  ;;  %v289_v63 = vld [vmem:[%s1706_s5 + $0x18] sm:$0xff]  ;;  %v288_v3 = vld [vmem:[%s1706_s5 + $0x10] sm:$0xff] }
  0x4f   :  { %184 = vmatpush1.msra.mxu0 %v143_v12  ;;  %v286_v7 = vld [vmem:[%s1706_s5] sm:$0xff]  ;;  %v427_v9 = vld [vmem:[%s1707_s6 + $0x38] sm:$0xff]  ;;  %v425_v11 = vld [vmem:[%s1707_s6 + $0x28] sm:$0xff] }
  0x50   :  { %130 = vadd.xlane.f32.xlu0 %v129_v5  ;;  %185 = vmatprep.subr.mxu0 %v142_v13  ;;  %v287_v5 = vld [vmem:[%s1706_s5 + $0x8] sm:$0xff]  ;;  %v424_v12 = vld [vmem:[%s1707_s6 + $0x20] sm:$0xff]  ;;  %v423_v13 = vld [vmem:[%s1707_s6 + $0x18] sm:$0xff] }
  0x51   :  { %186 = vmatpush1.msra.mxu0 %v141_v14  ;;  %240 = vrot.lane.b32.xlu1 %v236_v16, %s1411_s21  ;;  %v422_v14 = vld [vmem:[%s1707_s6 + $0x10] sm:$0xff]  ;;  %v303_v15 = vld [vmem:[#allocation8 + $0x8] sm:$0xff] }
  0x52   :  { %1131 = vmatprep.subr.mxu0 %v427_v9 }
  0xbf   :  { %v243_v27 = vpop.permute.xlu1 %242 }
  0xc3   :  { %v241_v28 = vpop.permute.xlu1 %240 }
  0xd5   :  { %v128_v17 = vpop.xlane.xlu0 %127 }
  0xd6   :  { %v133_v18 = vmul.f32 0.03125, %v128_v17  ;;  %v302_v17 = vld [vmem:[#allocation8] sm:$0xff] }
  0xd8   :  { %v135_v19 = vadd.f32 1e-06, %v133_v18 }
  0xd9   :  { %v131_v20 = vpop.xlane.xlu0 %130 }
  0xda   :  { %1228 = vrsqrt.f32 %v135_v19  ;;  %v134_v21 = vmul.f32 0.03125, %v131_v20 }
  0xdc   :  { %v136_v22 = vadd.f32 1e-06, %v134_v21 }
  0xde   :  { %1230 = vrsqrt.f32 %v136_v22 }
  0xe7   :  { %v1229_v23 = vpop.eup %1228 }
  0xe8   :  { %v139_v24 = vmul.f32 %v1229_v23, %v1511_v0  ;;  %v421_v23 = vld [vmem:[%s1707_s6 + $0x8] sm:$0xff] }
  0xea   :  { %1030 = vmatmul.mubr.msk.f32.vlgmr.msra.gmra.mxu0 %vm125_vm0, %v139_v24  ;;  %v420_v24 = vld [vmem:[%s1707_s6] sm:$0xff] }
  0xeb   :  { %v1231_v25 = vpop.eup %1230  ;;  %225 = vmatprep.mubr.f32.mxu0 %v1410_v10  ;;  %v426_v10 = vld [vmem:[%s1707_s6 + $0x30] sm:$0xff]  ;;  %1132 = vmatpush3.msra.mxu0 %v427_v9 }
  0xec   :  { %v140_v26 = vmul.f32 %v1231_v25, %v1513_v1  ;;  %1133 = vmatprep.subr.mxu0 %v426_v10  ;;  %v810_v9 = vld [vmem:[#allocation11 + $0x10] sm:$0xff] }
  0xed   :  { %1134 = vmatpush3.msra.mxu0 %v426_v10 }
  0xee   :  { %1031 = vmatmul.mubr.msk.f32.gmra.mxu0 %vm125_vm0, %v140_v26  ;;  %1135 = vmatprep.subr.mxu0 %v425_v11 }
  0xef   :  { %1136 = vmatpush3.msra.mxu0 %v425_v11 }
  0xf0   :  { %1137 = vmatprep.subr.mxu0 %v424_v12 }
  0xf1   :  { %1138 = vmatpush3.msra.mxu0 %v424_v12 }
  0xf2   :  { %1139 = vmatprep.subr.mxu0 %v423_v13 }
  0xf3   :  { %1140 = vmatpush3.msra.mxu0 %v423_v13 }
  0xf4   :  { %1141 = vmatprep.subr.mxu0 %v422_v14 }
  0xf5   :  { %1142 = vmatpush3.msra.mxu0 %v422_v14 }
  0xf6   :  { %1143 = vmatprep.subr.mxu0 %v421_v23 }
  0xf7   :  { %1144 = vmatpush3.msra.mxu0 %v421_v23  ;;  %v921_v23 = vld [vmem:[%s1711_s10 + $0x20] sm:$0xff] }
  0xf8   :  { %1145 = vmatprep.subr.mxu0 %v420_v24 }
  0xf9   :  { %1146 = vmatpush3.msra.mxu0 %v420_v24  ;;  %v920_v24 = vld [vmem:[%s1711_s10 + $0x18] sm:$0xff] }
 0x1aa   :  { %v221_v29 = vpop.f32.mrf.mxu0 }
 0x1ab   :  { %v246_v30 = vmul.f32 %v241_v28, %v221_v29  ;;  %v234_v45 = vmul.f32 %v232_v42, %v221_v29  ;;  %v708_v42 = vld [vmem:[#allocation10 + $0x18] sm:$0xff] }
 0x1ac   :  { %v223_v31 = vpop.f32.mrf.mxu0 }
 0x1ad   :  { %254 = vrot.lane.b32.xlu1 %v246_v30, %s1412_s1  ;;  %v247_v36 = vmul.f32 %v241_v28, %v223_v31 }
 0x1ae   :  { %v227_v32 = vpop.f32.mrf.mxu0 }
 0x1af   :  { %v248_v33 = vmul.f32 %v243_v27, %v227_v32  ;;  %v235_v39 = vmul.f32 %v233_v38, %v227_v32 }
 0x1b0   :  { %v229_v34 = vpop.f32.mrf.mxu0 }
 0x1b1   :  { %v249_v35 = vmul.f32 %v243_v27, %v229_v34  ;;  %258 = vrot.lane.b32.xlu0 %v248_v33, %s1412_s1 }
 0x1b3   :  { %260 = vrot.lane.b32.xlu1 %v249_v35, %s1412_s1 }
 0x1b5   :  { %278 = vrot.lane.b32.xlu0 %v221_v29, %s1411_s21 }
 0x1b7   :  { %256 = vrot.lane.b32.xlu1 %v247_v36, %s1412_s1  ;;  %s1413_s1 = smov 64  }
 0x1bb   :  { %280 = vrot.lane.b32.xlu1 %v227_v32, %s1411_s21 }
 0x21f   :  { %v255_v37 = vpop.permute.xlu1 %254 }
 0x223   :  { %v259_v40 = vpop.permute.xlu0 %258 }
 0x225   :  { %v261_v41 = vpop.permute.xlu1 %260 }
 0x226   :  { %v263_v43 = vsel %vm125_vm0, %v259_v40, %v261_v41  ;;  %v616_v41 = vld [vmem:[%s1708_s7] sm:$0xf] }
 0x227   :  { %v267_v44 = vadd.f32 %v263_v43, %v235_v39  ;;  %v279_v55 = vpop.permute.xlu0 %278 }
 0x229   :  { %272 = vrot.lane.b32.xlu1 %v267_v44, %s1411_s21  ;;  %v257_v46 = vpop.permute.xlu1 %256 }
 0x22a   :  { %v262_v47 = vsel %vm125_vm0, %v255_v37, %v257_v46 }
 0x22b   :  { %v266_v48 = vadd.f32 %v262_v47, %v234_v45 }
 0x22d   :  { %270 = vrot.lane.b32.xlu1 %v266_v48, %s1411_s21  ;;  %1128 = vmatprep.mubr.msk.f32.mxu1 %vm125_vm0, %v266_v48  ;;  %v281_v49 = vpop.permute.xlu1 %280 }
 0x29b   :  { %v273_v51 = vpop.permute.xlu1 %272 }
 0x29c   :  { %v285_v52 = vsel %vm125_vm0, %v273_v51, %v281_v49 }
 0x29d   :  { %v1562_v53 = vmul.f32 %v293_v50, %v285_v52  ;;  %v299_v60 = vmul.f32 %v291_v57, %v285_v52  ;;  %v297_v2 = vmul.f32 %v289_v63, %v285_v52  ;;  %v295_v6 = vmul.f32 %v287_v5, %v285_v52 }
 0x29f   :  { %1112 = vmatprep.subr.msk.mxu1 %vm125_vm0, %v1562_v53  ;;  %v271_v56 = vpop.permute.xlu1 %270 }
 0x2a0   :  { %v284_v58 = vsel %vm125_vm0, %v271_v56, %v279_v55  ;;  %1113 = vmatpush3.xpose.msk.msra.mxu1 %vm125_vm0, %v1562_v53  ;;  %v705_v55 = vld [vmem:[#allocation10] sm:$0xff] }
 0x2a1   :  { %v300_v59 = vmul.f32 %v292_v54, %v284_v58  ;;  %v298_v62 = vmul.f32 %v290_v61, %v284_v58  ;;  %v296_v4 = vmul.f32 %v288_v3, %v284_v58  ;;  %v294_v8 = vmul.f32 %v286_v7, %v284_v58  ;;  %v706_v54 = vld [vmem:[#allocation10 + $0x8] sm:$0xff] }
 0x2a3   :  { %1114 = vmatprep.subr.msk.mxu1 %vm125_vm0, %v300_v59 }
 0x2a4   :  { %1115 = vmatpush3.xpose.msk.msra.mxu1 %vm125_vm0, %v300_v59 }
 0x2a5   :  { %1116 = vmatprep.subr.msk.mxu1 %vm125_vm0, %v299_v60 }
 0x2a8   :  { %1117 = vmatpush3.xpose.msk.msra.mxu1 %vm125_vm0, %v299_v60 }
 0x2a9   :  { %1118 = vmatprep.subr.msk.mxu1 %vm125_vm0, %v298_v62 }
 0x2ac   :  { %1119 = vmatpush3.xpose.msk.msra.mxu1 %vm125_vm0, %v298_v62 }
 0x2ad   :  { %1120 = vmatprep.subr.msk.mxu1 %vm125_vm0, %v297_v2 }
 0x2b0   :  { %1121 = vmatpush3.xpose.msk.msra.mxu1 %vm125_vm0, %v297_v2 }
 0x2b1   :  { %1122 = vmatprep.subr.msk.mxu1 %vm125_vm0, %v296_v4 }
 0x2b4   :  { %1123 = vmatpush3.xpose.msk.msra.mxu1 %vm125_vm0, %v296_v4 }
 0x2b5   :  { %1124 = vmatprep.subr.msk.mxu1 %vm125_vm0, %v295_v6 }
 0x2b8   :  { %1125 = vmatpush3.xpose.msk.msra.mxu1 %vm125_vm0, %v295_v6 }
 0x2b9   :  { %1126 = vmatprep.subr.msk.mxu1 %vm125_vm0, %v294_v8 }
 0x2bc   :  { %1127 = vmatpush3.xpose.msk.msra.mxu1 %vm125_vm0, %v294_v8 }
 0x2bd   :  { %1174 = vmatprep.subr.mxu1 %v708_v42 }
 0x2bf   :  { %1129 = vmatmul.mubr.msk.f32.vlgmr.msra.gmra.mxu1 %vm125_vm0, %v267_v44 }
 0x2c0   :  { %1175 = vmatpush3.msra.mxu1 %v708_v42 }
 0x37f   :  { %v1130_v16 = vpop.f32.mrf.mxu1 }
 0x380   :  { %v404_v18 = vadd.f32 %v1130_v16, %v303_v15 }
 0x381   :  { %v398_v19 = vpop.f32.mrf.mxu1 }
 0x382   :  { %v399_v20 = vadd.f32 %v398_v19, %v302_v17  ;;  %v411_v21 = vsel %vm407_vm1, %v404_v18, -inf }
 0x383   :  { %412 = vmax.xlane.f32.xlu0 %v411_v21  ;;  %v923_v21 = vld [vmem:[%s1711_s10 + $0x30] sm:$0xff] }
 0x384   :  { %v408_v22 = vsel %vm407_vm1, %v399_v20, -inf }
 0x385   :  { %409 = vmax.xlane.f32.xlu1 %v408_v22  ;;  %v922_v22 = vld [vmem:[%s1711_s10 + $0x28] sm:$0xff] }
 0x396   :  { %529 = vrot.lane.b32.xlu1 %v300_v59, %s1411_s21 }
 0x399   :  { %531 = vrot.lane.b32.xlu0 %v1562_v53, %s1411_s21  ;;  %v707_v53 = vld [vmem:[#allocation10 + $0x10] sm:$0xff] }
 0x39a   :  { %527 = vrot.lane.b32.xlu1 %v299_v60, %s1411_s21  ;;  %1176 = vmatprep.subr.mxu1 %v707_v53 }
 0x39b   :  { %1177 = vmatpush3.msra.mxu1 %v707_v53 }
 0x39c   :  { %1178 = vmatprep.subr.mxu1 %v706_v54 }
 0x39d   :  { %525 = vrot.lane.b32.xlu0 %v298_v62, %s1411_s21  ;;  %1179 = vmatpush3.msra.mxu1 %v706_v54 }
 0x39e   :  { %523 = vrot.lane.b32.xlu1 %v297_v2, %s1411_s21  ;;  %1180 = vmatprep.subr.mxu1 %v705_v55 }
 0x39f   :  { %1181 = vmatpush3.msra.mxu1 %v705_v55 }
 0x3a1   :  { %521 = vrot.lane.b32.xlu0 %v296_v4, %s1411_s21 }
 0x3a2   :  { %519 = vrot.lane.b32.xlu1 %v295_v6, %s1411_s21 }
 0x3a5   :  { %517 = vrot.lane.b32.xlu0 %v294_v8, %s1411_s21  ;;  %v811_v8 = vld [vmem:[#allocation11 + $0x18] sm:$0xff] }
 0x40c   :  { %v413_v25 = vpop.xlane.xlu0 %412 }
 0x40d   :  { %v415_v26 = vsub.f32 %v404_v18, %v413_v25  ;;  %v919_v25 = vld [vmem:[%s1711_s10 + $0x10] sm:$0xff] }
 0x40e   :  { %v410_v27 = vpop.xlane.xlu1 %409 }
 0x40f   :  { %v414_v28 = vsub.f32 %v399_v20, %v410_v27  ;;  %v418_v29 = vmul.f32 1.442695, %v415_v26  ;;  %v924_v20 = vld [vmem:[%s1711_s10 + $0x38] sm:$0xff]  ;;  %v918_v26 = vld [vmem:[%s1711_s10 + $0x8] sm:$0xff]  ;;  %v917_v27 = vld [vmem:[%s1711_s10] sm:$0xff]  ;;  %s1414_s10 = smov [#allocation13]  }
 0x410   :  { %v532_v30 = vpop.permute.xlu0 %531  ;;  %1196 = vmatprep.subr.mxu1 %v924_v20  ;;  %s1015_s0 = sshll.u32 %s1414_s10, 4  ;;  %s1016_s0 = int_to_ptr.vmem [resolvable:$true] %s1015_s0 }
 0x411   :  { %v416_v31 = vmul.f32 1.442695, %v414_v28  ;;  %1150 = vmatprep.subr.mxu0 %v532_v30  ;;  %s1372_s24 = scalar_lea.vmem %s1016_s0, 256  ;;  %p1377_p3 = scmp.lt.s32.totalorder %s1016_s0, %s1016_s0 }
 0x412   :  { %v530_v32 = vpop.permute.xlu1 %529  ;;  %p1373_p2 = scmp.ne.s32.totalorder %s1016_s0, %s1372_s24  ;;  %p1378_p4 = scmp.lt.s32.totalorder %s1372_s24, %s1372_s24 }
 0x413   :  { %1232 = vpow2.f32 %v416_v31 }
 0x414   :  { %1234 = vpow2.f32 %v418_v29  ;;  %v526_v36 = vpop.permute.xlu0 %525  ;;  %p1379_p5 = por %p1378_p4, %p1377_p3 }
 0x416   :  { %v528_v35 = vpop.permute.xlu1 %527  ;;  %p1380_p6 = pnand %p1379_p5, %p1373_p2 }
 0x418   :  { %v522_v38 = vpop.permute.xlu0 %521 }
 0x41a   :  { %v524_v37 = vpop.permute.xlu1 %523 }
 0x41c   :  { %v518_v40 = vpop.permute.xlu0 %517 }
 0x41e   :  { %v520_v39 = vpop.permute.xlu1 %519 }
 0x420   :  { %v1233_v33 = vpop.eup %1232 }
 0x421   :  { %v1235_v34 = vpop.eup %1234  ;;  %1147 = vmatprep.mubr.msk.f32.mxu0 %vm407_vm1, %v1233_v33 }
 0x422   :  { %1148 = vmatmul.mubr.msk.f32.vlgmr.msra.gmra.mxu0 %vm407_vm1, %v1235_v34 }
 0x423   :  { %1151 = vmatpush3.msra.mxu0 %v532_v30  ;;  %1166 = vmatprep.mubr.msk.f32.mxu0 %vm407_vm1, %v1233_v33 }
 0x424   :  { %1152 = vmatprep.subr.mxu0 %v530_v32 }
 0x425   :  { %1153 = vmatpush3.msra.mxu0 %v530_v32 }
 0x426   :  { %1154 = vmatprep.subr.mxu0 %v528_v35 }
 0x427   :  { %1155 = vmatpush3.msra.mxu0 %v528_v35 }
 0x428   :  { %1156 = vmatprep.subr.mxu0 %v526_v36 }
 0x429   :  { %1157 = vmatpush3.msra.mxu0 %v526_v36 }
 0x42a   :  { %1158 = vmatprep.subr.mxu0 %v524_v37 }
 0x42b   :  { %1159 = vmatpush3.msra.mxu0 %v524_v37 }
 0x42c   :  { %1160 = vmatprep.subr.mxu0 %v522_v38 }
 0x42d   :  { %1161 = vmatpush3.msra.mxu0 %v522_v38 }
 0x42e   :  { %1162 = vmatprep.subr.mxu0 %v520_v39 }
 0x42f   :  { %1163 = vmatpush3.msra.mxu0 %v520_v39 }
 0x430   :  { %1164 = vmatprep.subr.mxu0 %v518_v40 }
 0x431   :  { %1165 = vmatpush3.msra.mxu0 %v518_v40 }
 0x432   :  { %1167 = vmatmul.mubr.msk.f32.vlgmr.msra.gmra.mxu0 %vm407_vm1, %v1235_v34  ;;  %1169 = vmatprep.subr.msk.mxu0 %vm624_vm2, %v616_v41 }
 0x433   :  { %1170 = vmatpush3.msk.msra.mxu0 %vm624_vm2, %v616_v41 }
 0x434   :  { %1185 = vmatprep.subr.mxu0 %v811_v8 }
 0x4e2   :  { %v1149_v43 = vpop.f32.mrf.mxu0 }
 0x4e3   :  { %1236 = vrcp.f32 %v1149_v43 }
 0x4e4   :  { %v500_v44 = vpop.f32.mrf.mxu0 }
 0x4e5   :  { %1238 = vrcp.f32 %v500_v44 }
 0x4f0   :  { %v1237_v45 = vpop.eup %1236 }
 0x4f1   :  { %v512_v46 = vmul.f32 %v1237_v45, %v1149_v43 }
 0x4f2   :  { %v1239_v47 = vpop.eup %1238  ;;  %v1168_v56 = vpop.f32.mrf.mxu0 }
 0x4f3   :  { %v511_v48 = vmul.f32 %v1239_v47, %v500_v44  ;;  %v514_v49 = vsub.f32 2.0, %v512_v46 }
 0x4f4   :  { %v607_v57 = vpop.f32.mrf.mxu0 }
 0x4f5   :  { %v513_v50 = vsub.f32 2.0, %v511_v48  ;;  %v516_v52 = vmul.f32 %v1237_v45, %v514_v49 }
 0x4f7   :  { %v515_v51 = vmul.f32 %v1239_v47, %v513_v50 }
 0x4f9   :  { %1171 = vmatprep.mubr.msk.f32.mxu0 %vm617_vm3, %v515_v51 }
 0x4fa   :  { %1172 = vmatmul.mubr.msk.f32.vlgmr.msra.gmra.mxu0 %vm617_vm3, %v516_v52 }
 0x4fb   :  { %1186 = vmatpush3.msra.mxu0 %v811_v8 }
 0x4fc   :  { %1187 = vmatprep.subr.mxu0 %v810_v9 }
 0x4fd   :  { %1188 = vmatpush3.msra.mxu0 %v810_v9 }
 0x5ba   :  { %v1173_v58 = vpop.f32.mrf.mxu0 }
 0x5bb   :  { %v704_v61 = vmul.f32 %v1173_v58, %v1168_v56 }
 0x5bc   :  { %v694_v59 = vpop.f32.mrf.mxu0 }
 0x5bd   :  { %v703_v60 = vmul.f32 %v694_v59, %v607_v57 }
 0x5bf   :  { %1182 = vmatprep.mubr.msk.f32.mxu1 %vm125_vm0, %v703_v60 }
 0x5c0   :  { %1183 = vmatmul.mubr.msk.f32.vlgmr.msra.gmra.mxu1 %vm125_vm0, %v704_v61 }
 0x5c1   :  { %1197 = vmatpush3.msra.mxu1 %v924_v20 }
 0x5c2   :  { %1198 = vmatprep.subr.mxu1 %v923_v21 }
 0x5c3   :  { %1199 = vmatpush3.msra.mxu1 %v923_v21 }
 0x5c4   :  { %1200 = vmatprep.subr.mxu1 %v922_v22 }
 0x5c5   :  { %1201 = vmatpush3.msra.mxu1 %v922_v22 }
 0x5c6   :  { %1202 = vmatprep.subr.mxu1 %v921_v23 }
 0x5c7   :  { %1203 = vmatpush3.msra.mxu1 %v921_v23 }
 0x5c8   :  { %1204 = vmatprep.subr.mxu1 %v920_v24 }
 0x5c9   :  { %1205 = vmatpush3.msra.mxu1 %v920_v24 }
 0x5ca   :  { %1206 = vmatprep.subr.mxu1 %v919_v25 }
 0x5cb   :  { %1207 = vmatpush3.msra.mxu1 %v919_v25 }
 0x5cc   :  { %1208 = vmatprep.subr.mxu1 %v918_v26 }
 0x5cd   :  { %1209 = vmatpush3.msra.mxu1 %v918_v26 }
 0x5ce   :  { %1210 = vmatprep.subr.mxu1 %v917_v27 }
 0x5cf   :  { %1211 = vmatpush3.msra.mxu1 %v917_v27 }
 0x680   :  { %v1184_v62 = vpop.f32.mrf.mxu1 }
 0x681   :  { %v1650_v63 = vadd.f32 %v1184_v62, %v1513_v1  ;;  %v809_v1 = vld [vmem:[#allocation11 + $0x8] sm:$0xff] }
 0x682   :  { %v781_v2 = vpop.f32.mrf.mxu1  ;;  %1189 = vmatprep.subr.mxu0 %v809_v1 }
 0x683   :  { %v1653_v3 = vadd.f32 %v781_v2, %v1511_v0  ;;  %v793_v4 = vmul.f32 %v1650_v63, %v1650_v63  ;;  %v808_v0 = vld [vmem:[#allocation11] sm:$0xff]  ;;  %1190 = vmatpush3.msra.mxu0 %v809_v1 }
 0x684   :  { %1191 = vmatprep.subr.mxu0 %v808_v0 }
 0x685   :  { %v797_v5 = vsel %vm125_vm0, %v793_v4, 0.0  ;;  %v792_v6 = vmul.f32 %v1653_v3, %v1653_v3  ;;  %1192 = vmatpush3.msra.mxu0 %v808_v0 }
 0x686   :  { %798 = vadd.xlane.f32.xlu0 %v797_v5 }
 0x687   :  { %v794_v7 = vsel %vm125_vm0, %v792_v6, 0.0 }
 0x688   :  { %795 = vadd.xlane.f32.xlu1 %v794_v7 }
 0x70f   :  { %v799_v10 = vpop.xlane.xlu0 %798 }
 0x710   :  { %v801_v11 = vmul.f32 0.03125, %v799_v10 }
 0x711   :  { %v796_v12 = vpop.xlane.xlu1 %795 }
 0x712   :  { %v803_v13 = vadd.f32 1e-06, %v801_v11  ;;  %v800_v14 = vmul.f32 0.03125, %v796_v12 }
 0x714   :  { %v802_v15 = vadd.f32 1e-06, %v800_v14  ;;  %1240 = vrsqrt.f32 %v803_v13 }
 0x716   :  { %1242 = vrsqrt.f32 %v802_v15 }
 0x721   :  { %v1241_v16 = vpop.eup %1240 }
 0x722   :  { %v807_v19 = vmul.f32 %v1241_v16, %v1650_v63 }
 0x723   :  { %v1243_v17 = vpop.eup %1242 }
 0x724   :  { %v806_v18 = vmul.f32 %v1243_v17, %v1653_v3 }
 0x726   :  { %1193 = vmatprep.mubr.msk.f32.mxu0 %vm125_vm0, %v806_v18 }
 0x727   :  { %1194 = vmatmul.mubr.msk.f32.vlgmr.msra.gmra.mxu0 %vm125_vm0, %v807_v19 }
 0x7e7   :  { %v1195_v28 = vpop.f32.mrf.mxu0 }
 0x7e8   :  { %911 = vrot.lane.b32.xlu1 %v1195_v28, %s1413_s1  ;;  %v1054_v31 = vmul.f32 -1.442695, %v1195_v28 }
 0x7e9   :  { %v884_v29 = vpop.f32.mrf.mxu0 }
 0x7ea   :  { %909 = vrot.lane.b32.xlu0 %v884_v29, %s1413_s1  ;;  %v1053_v30 = vmul.f32 -1.442695, %v884_v29 }
 0x7ec   :  { %1244 = vpow2.f32 %v1053_v30 }
 0x7ed   :  { %1246 = vpow2.f32 %v1054_v31 }
 0x7f9   :  { %v1245_v32 = vpop.eup %1244 }
 0x7fa   :  { %v1247_v33 = vpop.eup %1246  ;;  %v899_v34 = vadd.f32 1.0, %v1245_v32 }
 0x7fb   :  { %v900_v35 = vadd.f32 1.0, %v1247_v33 }
 0x7fc   :  { %1248 = vrcp.f32 %v899_v34 }
 0x7fd   :  { %1250 = vrcp.f32 %v900_v35 }
 0x809   :  { %v1249_v36 = vpop.eup %1248 }
 0x80a   :  { %v1251_v37 = vpop.eup %1250  ;;  %v905_v38 = vmul.f32 %v1249_v36, %v884_v29 }
 0x80b   :  { %v906_v40 = vmul.f32 %v1251_v37, %v1195_v28 }
 0x85a   :  { %v912_v39 = vpop.permute.xlu1 %911 }
 0x85b   :  { %v916_v43 = vmul.f32 %v912_v39, %v906_v40 }
 0x85c   :  { %v910_v41 = vpop.permute.xlu0 %909 }
 0x85d   :  { %v915_v42 = vmul.f32 %v910_v41, %v905_v38 }
 0x85f   :  { %1212 = vmatprep.mubr.msk.f32.mxu1 %vm407_vm1, %v915_v42 }
 0x860   :  { %1213 = vmatmul.mubr.msk.f32.vlgmr.msra.gmra.mxu1 %vm407_vm1, %v916_v43 }
 0x920   :  { %v1214_v44 = vpop.f32.mrf.mxu1 }
 0x921   :  { %v1007_v45 = vadd.f32 %v1214_v44, %v1650_v63 }
 0x922   :  { %v997_v46 = vpop.f32.mrf.mxu1 }
 0x923   :  { %1009 = vst.msk [vmem:[#allocation13 + $0x8] sm:$0xff] %vm125_vm0, %v1007_v45  ;;  %v1006_v47 = vadd.f32 %v997_v46, %v1653_v3 }
 0x925   :  { %1008 = vst.msk [vmem:[#allocation13] sm:$0xff] %vm125_vm0, %v1006_v47 }
 0x926   :  { %1383 = shalt.err (!%p1380_p6)
}
 0x927   :  { %1021 = dma.vmem_to_hbm [thread:$0]  %s1016_s0, 256, %s1712_s11, [#allocation4], %s1404_s22, %s1404_s22, %s1405_s23  }
 0x928   :  { %1400 = dma.done.wait [#allocation4], 256  }
 0x929   :  { %1401 = vsyncadd [#allocation4], 4294967040 }
 0x92a   :  { %1025 = vsyncpa [#allocation3], 1 }
 0x92b   :  { %1026 = vsyncpa [#allocation6], 1 }
 0x92c   :  { %1027 = vsyncpa [#allocation9], 1 }
 0x92d   :  { %1028 = vsyncpa [#allocation12], 1 }
 0x92e   :  { %1029 = vsyncpa [#allocation4], 1 }

</bundles_post_ra>
